<compile_context>
chip_gen: v5e
topology: v5e:2x2
jax: 0.10.0
libtpu: 0.0.40
codegen_flags: <defaults>
</compile_context>

<pallas_src>
import functools

import jax
import jax.numpy as jnp
from jax.experimental import pallas as pl
from jax.experimental.pallas import tpu as pltpu

N_BINS = 15          # matches _ECELoss(n_bins=15)
LANE = 128
SUB = 8              # per-bin partial = one (8,128) vreg row-block
MIN_ROWS = 8         # keep the row tile a multiple of 8 sublanes
TM_MAX = 2048        # large row tile amortizes per-grid-step overhead


def _ece_bin_kernel(x_ref, y_ref, cnt_ref, csum_ref, asum_ref, *,
                    n_bins, tm, n_valid, need_mask):
    """Accumulate per-bin (count, sum-of-confidence, sum-of-accuracy) partials.

    x_ref, y_ref : (tm, 128) f32 tiles of flattened logits / labels
    cnt_ref, csum_ref, asum_ref : (n_bins*8, 128) f32 resident accumulators
    """
    @pl.when(pl.program_id(0) == 0)
    def _init():
        cnt_ref[...] = jnp.zeros_like(cnt_ref)
        csum_ref[...] = jnp.zeros_like(csum_ref)
        asum_ref[...] = jnp.zeros_like(asum_ref)

    x = x_ref[...]
    y = y_ref[...]

    # sigmoid(x) = 0.5*tanh(0.5*x) + 0.5 -> transcendental runs on the EUP slot,
    # keeping the saturated VALU slots free.  (Deep-tail note: for x < ~-17.3
    # this saturates to exactly 0.0 and such elements fall out of bin 0; an
    # exp-based sigmoid keeps a ~1e-8 confidence there — negligible for ECE.)
    conf = 0.5 * jnp.tanh(0.5 * x) + 0.5

    if need_mask:
        # Elements with global flat index >= n_valid are wrapper padding or
        # Pallas ragged-block garbage.  Force their confidence to 0.0 so they
        # drop out of every bin (bin 0 has a strict > 0 lower bound, as in
        # PyTorch).  One scalar threshold works for every tile: full tiles get
        # rem >= tm*LANE, so everything stays valid there.
        row = jax.lax.broadcasted_iota(jnp.int32, (tm, LANE), 0)
        lane = jax.lax.broadcasted_iota(jnp.int32, (tm, LANE), 1)
        rem = n_valid - pl.program_id(0) * (tm * LANE)   # int32; assumes n < 2**31
        conf = jnp.where(row * LANE + lane < rem, conf, 0.0)

    pred = (conf > 0.5).astype(jnp.float32)      # predictions = confidences > 0.5
    acc = (pred == y).astype(jnp.float32)        # predictions.eq(labels)

    # Single bin-index computation: 0-based bin b  <=>  ceil(conf*n_bins) == b+1.
    # conf == 0 maps to 0 and is excluded from every bin.
    bin_idx = jnp.ceil(conf * jnp.float32(n_bins))

    def vreg_partial(v):
        # (tm,128) -> (8,128) using only full-vreg adds (no XLU cross-sublane reduce).
        if tm == SUB:
            return v
        return v.reshape(tm // SUB, SUB, LANE).sum(axis=0)

    for b in range(n_bins):
        mf = (bin_idx == jnp.float32(b + 1)).astype(jnp.float32)   # reused 3x
        r0 = b * SUB
        r1 = r0 + SUB
        cnt_ref[r0:r1, :] += vreg_partial(mf)
        csum_ref[r0:r1, :] += vreg_partial(conf * mf)
        asum_ref[r0:r1, :] += vreg_partial(acc * mf)


def ece_loss(logits, labels, n_bins=N_BINS, max_tile_rows=TM_MAX):
    """Expected Calibration Error; mirrors _ECELoss.forward. Returns shape (1,) f32."""
    assert max_tile_rows >= MIN_ROWS and max_tile_rows % SUB == 0
    x = logits.reshape(-1).astype(jnp.float32)
    y = labels.reshape(-1).astype(jnp.float32)   # labels stay f32 (no bf16 round-trip)
    n = x.shape[0]

    # Lane-dense (rows, 128) view.  When n is lane-aligned (and >= 1024) the
    # reshape is a free bitcast — no full-HBM pad pass.  Otherwise only the
    # tiny ragged tail is padded; the in-kernel count mask excludes it.
    rows = max(MIN_ROWS, (n + LANE - 1) // LANE)
    padded = rows * LANE
    if padded != n:
        x = jnp.pad(x, (0, padded - n))
        y = jnp.pad(y, (0, padded - n))
    xm = x.reshape(rows, LANE)
    ym = y.reshape(rows, LANE)

    tm = min(max_tile_rows, (rows // SUB) * SUB)     # multiple of 8, >= 8
    grid = (rows + tm - 1) // tm
    need_mask = (grid * tm * LANE) != n              # any padding / ragged garbage?

    acc_rows = n_bins * SUB                          # 120 sublanes, 128-lane-dense outputs
    stats = jax.ShapeDtypeStruct((acc_rows, LANE), jnp.float32)
    kernel = functools.partial(_ece_bin_kernel, n_bins=n_bins, tm=tm,
                               n_valid=n, need_mask=need_mask)

    # TODO(synk): on v7x, shard the row-tile axis across both TensorCores with
    # pltpu.CORE_PARALLEL (plain "parallel" does not change codegen); kept as a
    # single "arbitrary" reduction axis here for portability across v5e/v6e/v7x.
    cnt, csum, asum = pl.pallas_call(
        kernel,
        out_shape=(stats, stats, stats),
        grid_spec=pltpu.PrefetchScalarGridSpec(
            num_scalar_prefetch=0,
            grid=(grid,),
            in_specs=[
                pl.BlockSpec((tm, LANE), lambda i: (i, 0)),
                pl.BlockSpec((tm, LANE), lambda i: (i, 0)),
            ],
            out_specs=[
                pl.BlockSpec((acc_rows, LANE), lambda i: (0, 0)),
                pl.BlockSpec((acc_rows, LANE), lambda i: (0, 0)),
                pl.BlockSpec((acc_rows, LANE), lambda i: (0, 0)),
            ],
        ),
        compiler_params=pltpu.CompilerParams(
            dimension_semantics=("arbitrary",),
            vmem_limit_bytes=32 * 1024 * 1024,
        ),
    )(xm, ym)

    # Tiny 15-bin combine (glue): ece = sum_b |avg_conf_b - acc_b| * prop_b.
    # (Note: per-lane f32 accumulation can drift for extremely large n; fine here.)
    counts = cnt.reshape(n_bins, SUB, LANE).sum(axis=(1, 2))
    conf_sums = csum.reshape(n_bins, SUB, LANE).sum(axis=(1, 2))
    acc_sums = asum.reshape(n_bins, SUB, LANE).sum(axis=(1, 2))

    prop_in_bin = counts / jnp.float32(n)
    safe = jnp.maximum(counts, 1.0)
    # The PyTorch host-side `if prop_in_bin.item() > 0:` branch becomes a masked where.
    gaps = jnp.where(counts > 0,
                     jnp.abs(conf_sums / safe - acc_sums / safe) * prop_in_bin,
                     0.0)
    return jnp.sum(gaps).reshape(1)


def _ece_reference(logits, labels, n_bins=N_BINS):
    """Pure-JAX reference mirroring the PyTorch loop, for correctness checking."""
    conf = jax.nn.sigmoid(logits.reshape(-1).astype(jnp.float32))
    pred = (conf > 0.5).astype(jnp.float32)
    acc = (pred == labels.reshape(-1).astype(jnp.float32)).astype(jnp.float32)
    ece = jnp.zeros((1,), jnp.float32)
    for b in range(n_bins):
        lo, hi = b / n_bins, (b + 1) / n_bins
        in_bin = jnp.logical_and(conf > lo, conf <= hi).astype(jnp.float32)
        prop = jnp.mean(in_bin)
        count = jnp.sum(in_bin)
        safe = jnp.maximum(count, 1.0)
        acc_in = jnp.sum(acc * in_bin) / safe
        conf_in = jnp.sum(conf * in_bin) / safe
        ece = ece + jnp.where(count > 0, jnp.abs(conf_in - acc_in) * prop, 0.0)
    return ece


if __name__ == "__main__":
    key = jax.random.PRNGKey(0)
    k1, k2, k3, k4, k5, k6 = jax.random.split(key, 6)

    # Case 1: small NCHW logits (512 elems): pad-to-8-rows + in-kernel tail mask.
    logits1 = 2.0 * jax.random.normal(k1, (2, 1, 16, 16), dtype=jnp.float32)
    labels1 = (jax.random.uniform(k2, (2, 1, 16, 16)) > 0.5).astype(jnp.float32)

    # Case 2: ragged element count (858): exercises lane-tail masking.
    logits2 = 1.5 * jax.random.normal(k3, (2, 3, 11, 13), dtype=jnp.float32)
    labels2 = (jax.random.uniform(k4, (2, 3, 11, 13)) > 0.5).astype(jnp.float32)

    # Case 3: 2048 elems with tile_rows=8 -> grid of 2: exercises the
    # multi-step resident-accumulator reduction (no pad, no mask).
    logits3 = 2.0 * jax.random.normal(k5, (2, 4, 16, 16), dtype=jnp.float32)
    labels3 = (jax.random.uniform(k6, (2, 4, 16, 16)) > 0.5).astype(jnp.float32)

    cases = [
        (logits1, labels1, {}),
        (logits2, labels2, {}),
        (logits3, labels3, {"max_tile_rows": 8}),
    ]
    for lg, lb, kw in cases:
        ece = jax.block_until_ready(ece_loss(lg, lb, **kw))
        ref = jax.block_until_ready(_ece_reference(lg, lb))
        assert ece.shape == (1,)
        assert jnp.allclose(ece, ref, atol=1e-5), (ece, ref)
    print("KERNEL_OK")
</pallas_src>

<mosaic_0001>
module attributes {stable_mosaic.version = 11 : i64} {
  func.func @_ece_bin_kernel(%arg0: i32, %arg1: memref<8x128xf32, #tpu.memory_space<vmem>>, %arg2: memref<8x128xf32, #tpu.memory_space<vmem>>, %arg3: memref<120x128xf32, #tpu.memory_space<vmem>>, %arg4: memref<120x128xf32, #tpu.memory_space<vmem>>, %arg5: memref<120x128xf32, #tpu.memory_space<vmem>>) attributes {dimension_semantics = [#tpu.dimension_semantics<arbitrary>], iteration_bounds = array<i64: 1>, scalar_prefetch = 0 : i64, scratch_operands = 0 : i64, tpu.core_type = #tpu.core_type<tc>, window_params = [{transform_indices = @transform_0, window_bounds = array<i64: 8, 128>}, {transform_indices = @transform_1, window_bounds = array<i64: 8, 128>}, {pipeline_mode = #tpu.pipeline_mode<synchronous>, transform_indices = @transform_2, window_bounds = array<i64: 120, 128>}, {pipeline_mode = #tpu.pipeline_mode<synchronous>, transform_indices = @transform_3, window_bounds = array<i64: 120, 128>}, {pipeline_mode = #tpu.pipeline_mode<synchronous>, transform_indices = @transform_4, window_bounds = array<i64: 120, 128>}]} {
    %c0_i32 = arith.constant 0 : i32
    %0 = arith.cmpi eq, %arg0, %c0_i32 : i32
    %1 = arith.extui %0 : i1 to i32
    %c0_i32_0 = arith.constant 0 : i32
    %2 = arith.cmpi ne, %1, %c0_i32_0 : i32
    scf.if %2 {
      %cst_190 = arith.constant 0.000000e+00 : f32
      %258 = vector.broadcast %cst_190 : f32 to vector<120x128xf32>
      %c0_191 = arith.constant 0 : index
      %c0_192 = arith.constant 0 : index
      %259 = vector.load %arg3[%c0_191, %c0_192] : memref<120x128xf32, #tpu.memory_space<vmem>>, vector<120x128xf32>
      tpu.vector_store %arg3[%c0_191, %c0_192], %258 {strides = array<i32>} : memref<120x128xf32, #tpu.memory_space<vmem>>, vector<120x128xf32>,
      %cst_193 = arith.constant 0.000000e+00 : f32
      %260 = vector.broadcast %cst_193 : f32 to vector<120x128xf32>
      %c0_194 = arith.constant 0 : index
      %c0_195 = arith.constant 0 : index
      %261 = vector.load %arg4[%c0_194, %c0_195] : memref<120x128xf32, #tpu.memory_space<vmem>>, vector<120x128xf32>
      tpu.vector_store %arg4[%c0_194, %c0_195], %260 {strides = array<i32>} : memref<120x128xf32, #tpu.memory_space<vmem>>, vector<120x128xf32>,
      %cst_196 = arith.constant 0.000000e+00 : f32
      %262 = vector.broadcast %cst_196 : f32 to vector<120x128xf32>
      %c0_197 = arith.constant 0 : index
      %c0_198 = arith.constant 0 : index
      %263 = vector.load %arg5[%c0_197, %c0_198] : memref<120x128xf32, #tpu.memory_space<vmem>>, vector<120x128xf32>
      tpu.vector_store %arg5[%c0_197, %c0_198], %262 {strides = array<i32>} : memref<120x128xf32, #tpu.memory_space<vmem>>, vector<120x128xf32>,
    } else {
    }
    %c0 = arith.constant 0 : index
    %c0_1 = arith.constant 0 : index
    %3 = vector.load %arg1[%c0, %c0_1] : memref<8x128xf32, #tpu.memory_space<vmem>>, vector<8x128xf32>
    %c0_2 = arith.constant 0 : index
    %c0_3 = arith.constant 0 : index
    %4 = vector.load %arg2[%c0_2, %c0_3] : memref<8x128xf32, #tpu.memory_space<vmem>>, vector<8x128xf32>
    %cst = arith.constant 5.000000e-01 : f32
    %5 = vector.broadcast %cst : f32 to vector<8x128xf32>
    %6 = arith.mulf %5, %3 : vector<8x128xf32>
    %7 = math.tanh %6 : vector<8x128xf32>
    %cst_4 = arith.constant 5.000000e-01 : f32
    %8 = vector.broadcast %cst_4 : f32 to vector<8x128xf32>
    %9 = arith.mulf %8, %7 : vector<8x128xf32>
    %cst_5 = arith.constant 5.000000e-01 : f32
    %10 = vector.broadcast %cst_5 : f32 to vector<8x128xf32>
    %11 = arith.addf %9, %10 : vector<8x128xf32>
    %12 = tpu.iota {dimensions = array<i32: 0>} : vector<8x128xi32>
    %13 = tpu.iota {dimensions = array<i32: 1>} : vector<8x128xi32>
    %c1024_i32 = arith.constant 1024 : i32
    %14 = arith.muli %arg0, %c1024_i32 : i32
    %c512_i32 = arith.constant 512 : i32
    %15 = arith.subi %c512_i32, %14 : i32
    %c128_i32 = arith.constant 128 : i32
    %16 = vector.broadcast %c128_i32 : i32 to vector<8x128xi32>
    %17 = arith.muli %12, %16 : vector<8x128xi32>
    %18 = arith.addi %17, %13 : vector<8x128xi32>
    %19 = vector.broadcast %15 : i32 to vector<8x128xi32>
    %20 = arith.cmpi slt, %18, %19 : vector<8x128xi32>
    %cst_6 = arith.constant 0.000000e+00 : f32
    %21 = vector.broadcast %cst_6 : f32 to vector<8x128xf32>
    %22 = arith.select %20, %11, %21 : vector<8x128xi1>, vector<8x128xf32>
    %cst_7 = arith.constant 5.000000e-01 : f32
    %23 = vector.broadcast %cst_7 : f32 to vector<8x128xf32>
    %24 = arith.cmpf ogt, %22, %23 : vector<8x128xf32>
    %25 = arith.extui %24 : vector<8x128xi1> to vector<8x128xi32>
    %26 = arith.sitofp %25 : vector<8x128xi32> to vector<8x128xf32>
    %27 = arith.cmpf oeq, %26, %4 : vector<8x128xf32>
    %28 = arith.extui %27 : vector<8x128xi1> to vector<8x128xi32>
    %29 = arith.sitofp %28 : vector<8x128xi32> to vector<8x128xf32>
    %cst_8 = arith.constant 1.500000e+01 : f32
    %30 = vector.broadcast %cst_8 : f32 to vector<8x128xf32>
    %31 = arith.mulf %22, %30 : vector<8x128xf32>
    %32 = math.ceil %31 : vector<8x128xf32>
    %cst_9 = arith.constant 1.000000e+00 : f32
    %33 = vector.broadcast %cst_9 : f32 to vector<8x128xf32>
    %34 = arith.cmpf oeq, %32, %33 : vector<8x128xf32>
    %35 = arith.extui %34 : vector<8x128xi1> to vector<8x128xi32>
    %36 = arith.sitofp %35 : vector<8x128xi32> to vector<8x128xf32>
    %c0_10 = arith.constant 0 : index
    %c0_11 = arith.constant 0 : index
    %37 = vector.load %arg3[%c0_10, %c0_11] : memref<120x128xf32, #tpu.memory_space<vmem>>, vector<8x128xf32>
    %38 = arith.addf %37, %36 : vector<8x128xf32>
    %c0_12 = arith.constant 0 : index
    %c0_13 = arith.constant 0 : index
    %39 = vector.load %arg3[%c0_12, %c0_13] : memref<120x128xf32, #tpu.memory_space<vmem>>, vector<8x128xf32>
    tpu.vector_store %arg3[%c0_12, %c0_13], %38 {strides = array<i32>} : memref<120x128xf32, #tpu.memory_space<vmem>>, vector<8x128xf32>,
    %c0_14 = arith.constant 0 : index
    %c0_15 = arith.constant 0 : index
    %40 = vector.load %arg4[%c0_14, %c0_15] : memref<120x128xf32, #tpu.memory_space<vmem>>, vector<8x128xf32>
    %41 = arith.mulf %22, %36 : vector<8x128xf32>
    %42 = arith.addf %40, %41 : vector<8x128xf32>
    %c0_16 = arith.constant 0 : index
    %c0_17 = arith.constant 0 : index
    %43 = vector.load %arg4[%c0_16, %c0_17] : memref<120x128xf32, #tpu.memory_space<vmem>>, vector<8x128xf32>
    tpu.vector_store %arg4[%c0_16, %c0_17], %42 {strides = array<i32>} : memref<120x128xf32, #tpu.memory_space<vmem>>, vector<8x128xf32>,
    %c0_18 = arith.constant 0 : index
    %c0_19 = arith.constant 0 : index
    %44 = vector.load %arg5[%c0_18, %c0_19] : memref<120x128xf32, #tpu.memory_space<vmem>>, vector<8x128xf32>
    %45 = arith.mulf %29, %36 : vector<8x128xf32>
    %46 = arith.addf %44, %45 : vector<8x128xf32>
    %c0_20 = arith.constant 0 : index
    %c0_21 = arith.constant 0 : index
    %47 = vector.load %arg5[%c0_20, %c0_21] : memref<120x128xf32, #tpu.memory_space<vmem>>, vector<8x128xf32>
    tpu.vector_store %arg5[%c0_20, %c0_21], %46 {strides = array<i32>} : memref<120x128xf32, #tpu.memory_space<vmem>>, vector<8x128xf32>,
    %cst_22 = arith.constant 2.000000e+00 : f32
    %48 = vector.broadcast %cst_22 : f32 to vector<8x128xf32>
    %49 = arith.cmpf oeq, %32, %48 : vector<8x128xf32>
    %50 = arith.extui %49 : vector<8x128xi1> to vector<8x128xi32>
    %51 = arith.sitofp %50 : vector<8x128xi32> to vector<8x128xf32>
    %c8 = arith.constant 8 : index
    %c0_23 = arith.constant 0 : index
    %52 = vector.load %arg3[%c8, %c0_23] : memref<120x128xf32, #tpu.memory_space<vmem>>, vector<8x128xf32>
    %53 = arith.addf %52, %51 : vector<8x128xf32>
    %c8_24 = arith.constant 8 : index
    %c0_25 = arith.constant 0 : index
    %54 = vector.load %arg3[%c8_24, %c0_25] : memref<120x128xf32, #tpu.memory_space<vmem>>, vector<8x128xf32>
    tpu.vector_store %arg3[%c8_24, %c0_25], %53 {strides = array<i32>} : memref<120x128xf32, #tpu.memory_space<vmem>>, vector<8x128xf32>,
    %c8_26 = arith.constant 8 : index
    %c0_27 = arith.constant 0 : index
    %55 = vector.load %arg4[%c8_26, %c0_27] : memref<120x128xf32, #tpu.memory_space<vmem>>, vector<8x128xf32>
    %56 = arith.mulf %22, %51 : vector<8x128xf32>
    %57 = arith.addf %55, %56 : vector<8x128xf32>
    %c8_28 = arith.constant 8 : index
    %c0_29 = arith.constant 0 : index
    %58 = vector.load %arg4[%c8_28, %c0_29] : memref<120x128xf32, #tpu.memory_space<vmem>>, vector<8x128xf32>
    tpu.vector_store %arg4[%c8_28, %c0_29], %57 {strides = array<i32>} : memref<120x128xf32, #tpu.memory_space<vmem>>, vector<8x128xf32>,
    %c8_30 = arith.constant 8 : index
    %c0_31 = arith.constant 0 : index
    %59 = vector.load %arg5[%c8_30, %c0_31] : memref<120x128xf32, #tpu.memory_space<vmem>>, vector<8x128xf32>
    %60 = arith.mulf %29, %51 : vector<8x128xf32>
    %61 = arith.addf %59, %60 : vector<8x128xf32>
    %c8_32 = arith.constant 8 : index
    %c0_33 = arith.constant 0 : index
    %62 = vector.load %arg5[%c8_32, %c0_33] : memref<120x128xf32, #tpu.memory_space<vmem>>, vector<8x128xf32>
    tpu.vector_store %arg5[%c8_32, %c0_33], %61 {strides = array<i32>} : memref<120x128xf32, #tpu.memory_space<vmem>>, vector<8x128xf32>,
    %cst_34 = arith.constant 3.000000e+00 : f32
    %63 = vector.broadcast %cst_34 : f32 to vector<8x128xf32>
    %64 = arith.cmpf oeq, %32, %63 : vector<8x128xf32>
    %65 = arith.extui %64 : vector<8x128xi1> to vector<8x128xi32>
    %66 = arith.sitofp %65 : vector<8x128xi32> to vector<8x128xf32>
    %c16 = arith.constant 16 : index
    %c0_35 = arith.constant 0 : index
    %67 = vector.load %arg3[%c16, %c0_35] : memref<120x128xf32, #tpu.memory_space<vmem>>, vector<8x128xf32>
    %68 = arith.addf %67, %66 : vector<8x128xf32>
    %c16_36 = arith.constant 16 : index
    %c0_37 = arith.constant 0 : index
    %69 = vector.load %arg3[%c16_36, %c0_37] : memref<120x128xf32, #tpu.memory_space<vmem>>, vector<8x128xf32>
    tpu.vector_store %arg3[%c16_36, %c0_37], %68 {strides = array<i32>} : memref<120x128xf32, #tpu.memory_space<vmem>>, vector<8x128xf32>,
    %c16_38 = arith.constant 16 : index
    %c0_39 = arith.constant 0 : index
    %70 = vector.load %arg4[%c16_38, %c0_39] : memref<120x128xf32, #tpu.memory_space<vmem>>, vector<8x128xf32>
    %71 = arith.mulf %22, %66 : vector<8x128xf32>
    %72 = arith.addf %70, %71 : vector<8x128xf32>
    %c16_40 = arith.constant 16 : index
    %c0_41 = arith.constant 0 : index
    %73 = vector.load %arg4[%c16_40, %c0_41] : memref<120x128xf32, #tpu.memory_space<vmem>>, vector<8x128xf32>
    tpu.vector_store %arg4[%c16_40, %c0_41], %72 {strides = array<i32>} : memref<120x128xf32, #tpu.memory_space<vmem>>, vector<8x128xf32>,
    %c16_42 = arith.constant 16 : index
    %c0_43 = arith.constant 0 : index
    %74 = vector.load %arg5[%c16_42, %c0_43] : memref<120x128xf32, #tpu.memory_space<vmem>>, vector<8x128xf32>
    %75 = arith.mulf %29, %66 : vector<8x128xf32>
    %76 = arith.addf %74, %75 : vector<8x128xf32>
    %c16_44 = arith.constant 16 : index
    %c0_45 = arith.constant 0 : index
    %77 = vector.load %arg5[%c16_44, %c0_45] : memref<120x128xf32, #tpu.memory_space<vmem>>, vector<8x128xf32>
    tpu.vector_store %arg5[%c16_44, %c0_45], %76 {strides = array<i32>} : memref<120x128xf32, #tpu.memory_space<vmem>>, vector<8x128xf32>,
    %cst_46 = arith.constant 4.000000e+00 : f32
    %78 = vector.broadcast %cst_46 : f32 to vector<8x128xf32>
    %79 = arith.cmpf oeq, %32, %78 : vector<8x128xf32>
    %80 = arith.extui %79 : vector<8x128xi1> to vector<8x128xi32>
    %81 = arith.sitofp %80 : vector<8x128xi32> to vector<8x128xf32>
    %c24 = arith.constant 24 : index
    %c0_47 = arith.constant 0 : index
    %82 = vector.load %arg3[%c24, %c0_47] : memref<120x128xf32, #tpu.memory_space<vmem>>, vector<8x128xf32>
    %83 = arith.addf %82, %81 : vector<8x128xf32>
    %c24_48 = arith.constant 24 : index
    %c0_49 = arith.constant 0 : index
    %84 = vector.load %arg3[%c24_48, %c0_49] : memref<120x128xf32, #tpu.memory_space<vmem>>, vector<8x128xf32>
    tpu.vector_store %arg3[%c24_48, %c0_49], %83 {strides = array<i32>} : memref<120x128xf32, #tpu.memory_space<vmem>>, vector<8x128xf32>,
    %c24_50 = arith.constant 24 : index
    %c0_51 = arith.constant 0 : index
    %85 = vector.load %arg4[%c24_50, %c0_51] : memref<120x128xf32, #tpu.memory_space<vmem>>, vector<8x128xf32>
    %86 = arith.mulf %22, %81 : vector<8x128xf32>
    %87 = arith.addf %85, %86 : vector<8x128xf32>
    %c24_52 = arith.constant 24 : index
    %c0_53 = arith.constant 0 : index
    %88 = vector.load %arg4[%c24_52, %c0_53] : memref<120x128xf32, #tpu.memory_space<vmem>>, vector<8x128xf32>
    tpu.vector_store %arg4[%c24_52, %c0_53], %87 {strides = array<i32>} : memref<120x128xf32, #tpu.memory_space<vmem>>, vector<8x128xf32>,
    %c24_54 = arith.constant 24 : index
    %c0_55 = arith.constant 0 : index
    %89 = vector.load %arg5[%c24_54, %c0_55] : memref<120x128xf32, #tpu.memory_space<vmem>>, vector<8x128xf32>
    %90 = arith.mulf %29, %81 : vector<8x128xf32>
    %91 = arith.addf %89, %90 : vector<8x128xf32>
    %c24_56 = arith.constant 24 : index
    %c0_57 = arith.constant 0 : index
    %92 = vector.load %arg5[%c24_56, %c0_57] : memref<120x128xf32, #tpu.memory_space<vmem>>, vector<8x128xf32>
    tpu.vector_store %arg5[%c24_56, %c0_57], %91 {strides = array<i32>} : memref<120x128xf32, #tpu.memory_space<vmem>>, vector<8x128xf32>,
    %cst_58 = arith.constant 5.000000e+00 : f32
    %93 = vector.broadcast %cst_58 : f32 to vector<8x128xf32>
    %94 = arith.cmpf oeq, %32, %93 : vector<8x128xf32>
    %95 = arith.extui %94 : vector<8x128xi1> to vector<8x128xi32>
    %96 = arith.sitofp %95 : vector<8x128xi32> to vector<8x128xf32>
    %c32 = arith.constant 32 : index
    %c0_59 = arith.constant 0 : index
    %97 = vector.load %arg3[%c32, %c0_59] : memref<120x128xf32, #tpu.memory_space<vmem>>, vector<8x128xf32>
    %98 = arith.addf %97, %96 : vector<8x128xf32>
    %c32_60 = arith.constant 32 : index
    %c0_61 = arith.constant 0 : index
    %99 = vector.load %arg3[%c32_60, %c0_61] : memref<120x128xf32, #tpu.memory_space<vmem>>, vector<8x128xf32>
    tpu.vector_store %arg3[%c32_60, %c0_61], %98 {strides = array<i32>} : memref<120x128xf32, #tpu.memory_space<vmem>>, vector<8x128xf32>,
    %c32_62 = arith.constant 32 : index
    %c0_63 = arith.constant 0 : index
    %100 = vector.load %arg4[%c32_62, %c0_63] : memref<120x128xf32, #tpu.memory_space<vmem>>, vector<8x128xf32>
    %101 = arith.mulf %22, %96 : vector<8x128xf32>
    %102 = arith.addf %100, %101 : vector<8x128xf32>
    %c32_64 = arith.constant 32 : index
    %c0_65 = arith.constant 0 : index
    %103 = vector.load %arg4[%c32_64, %c0_65] : memref<120x128xf32, #tpu.memory_space<vmem>>, vector<8x128xf32>
    tpu.vector_store %arg4[%c32_64, %c0_65], %102 {strides = array<i32>} : memref<120x128xf32, #tpu.memory_space<vmem>>, vector<8x128xf32>,
    %c32_66 = arith.constant 32 : index
    %c0_67 = arith.constant 0 : index
    %104 = vector.load %arg5[%c32_66, %c0_67] : memref<120x128xf32, #tpu.memory_space<vmem>>, vector<8x128xf32>
    %105 = arith.mulf %29, %96 : vector<8x128xf32>
    %106 = arith.addf %104, %105 : vector<8x128xf32>
    %c32_68 = arith.constant 32 : index
    %c0_69 = arith.constant 0 : index
    %107 = vector.load %arg5[%c32_68, %c0_69] : memref<120x128xf32, #tpu.memory_space<vmem>>, vector<8x128xf32>
    tpu.vector_store %arg5[%c32_68, %c0_69], %106 {strides = array<i32>} : memref<120x128xf32, #tpu.memory_space<vmem>>, vector<8x128xf32>,
    %cst_70 = arith.constant 6.000000e+00 : f32
    %108 = vector.broadcast %cst_70 : f32 to vector<8x128xf32>
    %109 = arith.cmpf oeq, %32, %108 : vector<8x128xf32>
    %110 = arith.extui %109 : vector<8x128xi1> to vector<8x128xi32>
    %111 = arith.sitofp %110 : vector<8x128xi32> to vector<8x128xf32>
    %c40 = arith.constant 40 : index
    %c0_71 = arith.constant 0 : index
    %112 = vector.load %arg3[%c40, %c0_71] : memref<120x128xf32, #tpu.memory_space<vmem>>, vector<8x128xf32>
    %113 = arith.addf %112, %111 : vector<8x128xf32>
    %c40_72 = arith.constant 40 : index
    %c0_73 = arith.constant 0 : index
    %114 = vector.load %arg3[%c40_72, %c0_73] : memref<120x128xf32, #tpu.memory_space<vmem>>, vector<8x128xf32>
    tpu.vector_store %arg3[%c40_72, %c0_73], %113 {strides = array<i32>} : memref<120x128xf32, #tpu.memory_space<vmem>>, vector<8x128xf32>,
    %c40_74 = arith.constant 40 : index
    %c0_75 = arith.constant 0 : index
    %115 = vector.load %arg4[%c40_74, %c0_75] : memref<120x128xf32, #tpu.memory_space<vmem>>, vector<8x128xf32>
    %116 = arith.mulf %22, %111 : vector<8x128xf32>
    %117 = arith.addf %115, %116 : vector<8x128xf32>
    %c40_76 = arith.constant 40 : index
    %c0_77 = arith.constant 0 : index
    %118 = vector.load %arg4[%c40_76, %c0_77] : memref<120x128xf32, #tpu.memory_space<vmem>>, vector<8x128xf32>
    tpu.vector_store %arg4[%c40_76, %c0_77], %117 {strides = array<i32>} : memref<120x128xf32, #tpu.memory_space<vmem>>, vector<8x128xf32>,
    %c40_78 = arith.constant 40 : index
    %c0_79 = arith.constant 0 : index
    %119 = vector.load %arg5[%c40_78, %c0_79] : memref<120x128xf32, #tpu.memory_space<vmem>>, vector<8x128xf32>
    %120 = arith.mulf %29, %111 : vector<8x128xf32>
    %121 = arith.addf %119, %120 : vector<8x128xf32>
    %c40_80 = arith.constant 40 : index
    %c0_81 = arith.constant 0 : index
    %122 = vector.load %arg5[%c40_80, %c0_81] : memref<120x128xf32, #tpu.memory_space<vmem>>, vector<8x128xf32>
    tpu.vector_store %arg5[%c40_80, %c0_81], %121 {strides = array<i32>} : memref<120x128xf32, #tpu.memory_space<vmem>>, vector<8x128xf32>,
    %cst_82 = arith.constant 7.000000e+00 : f32
    %123 = vector.broadcast %cst_82 : f32 to vector<8x128xf32>
    %124 = arith.cmpf oeq, %32, %123 : vector<8x128xf32>
    %125 = arith.extui %124 : vector<8x128xi1> to vector<8x128xi32>
    %126 = arith.sitofp %125 : vector<8x128xi32> to vector<8x128xf32>
    %c48 = arith.constant 48 : index
    %c0_83 = arith.constant 0 : index
    %127 = vector.load %arg3[%c48, %c0_83] : memref<120x128xf32, #tpu.memory_space<vmem>>, vector<8x128xf32>
    %128 = arith.addf %127, %126 : vector<8x128xf32>
    %c48_84 = arith.constant 48 : index
    %c0_85 = arith.constant 0 : index
    %129 = vector.load %arg3[%c48_84, %c0_85] : memref<120x128xf32, #tpu.memory_space<vmem>>, vector<8x128xf32>
    tpu.vector_store %arg3[%c48_84, %c0_85], %128 {strides = array<i32>} : memref<120x128xf32, #tpu.memory_space<vmem>>, vector<8x128xf32>,
    %c48_86 = arith.constant 48 : index
    %c0_87 = arith.constant 0 : index
    %130 = vector.load %arg4[%c48_86, %c0_87] : memref<120x128xf32, #tpu.memory_space<vmem>>, vector<8x128xf32>
    %131 = arith.mulf %22, %126 : vector<8x128xf32>
    %132 = arith.addf %130, %131 : vector<8x128xf32>
    %c48_88 = arith.constant 48 : index
    %c0_89 = arith.constant 0 : index
    %133 = vector.load %arg4[%c48_88, %c0_89] : memref<120x128xf32, #tpu.memory_space<vmem>>, vector<8x128xf32>
    tpu.vector_store %arg4[%c48_88, %c0_89], %132 {strides = array<i32>} : memref<120x128xf32, #tpu.memory_space<vmem>>, vector<8x128xf32>,
    %c48_90 = arith.constant 48 : index
    %c0_91 = arith.constant 0 : index
    %134 = vector.load %arg5[%c48_90, %c0_91] : memref<120x128xf32, #tpu.memory_space<vmem>>, vector<8x128xf32>
    %135 = arith.mulf %29, %126 : vector<8x128xf32>
    %136 = arith.addf %134, %135 : vector<8x128xf32>
    %c48_92 = arith.constant 48 : index
    %c0_93 = arith.constant 0 : index
    %137 = vector.load %arg5[%c48_92, %c0_93] : memref<120x128xf32, #tpu.memory_space<vmem>>, vector<8x128xf32>
    tpu.vector_store %arg5[%c48_92, %c0_93], %136 {strides = array<i32>} : memref<120x128xf32, #tpu.memory_space<vmem>>, vector<8x128xf32>,
    %cst_94 = arith.constant 8.000000e+00 : f32
    %138 = vector.broadcast %cst_94 : f32 to vector<8x128xf32>
    %139 = arith.cmpf oeq, %32, %138 : vector<8x128xf32>
    %140 = arith.extui %139 : vector<8x128xi1> to vector<8x128xi32>
    %141 = arith.sitofp %140 : vector<8x128xi32> to vector<8x128xf32>
    %c56 = arith.constant 56 : index
    %c0_95 = arith.constant 0 : index
    %142 = vector.load %arg3[%c56, %c0_95] : memref<120x128xf32, #tpu.memory_space<vmem>>, vector<8x128xf32>
    %143 = arith.addf %142, %141 : vector<8x128xf32>
    %c56_96 = arith.constant 56 : index
    %c0_97 = arith.constant 0 : index
    %144 = vector.load %arg3[%c56_96, %c0_97] : memref<120x128xf32, #tpu.memory_space<vmem>>, vector<8x128xf32>
    tpu.vector_store %arg3[%c56_96, %c0_97], %143 {strides = array<i32>} : memref<120x128xf32, #tpu.memory_space<vmem>>, vector<8x128xf32>,
    %c56_98 = arith.constant 56 : index
    %c0_99 = arith.constant 0 : index
    %145 = vector.load %arg4[%c56_98, %c0_99] : memref<120x128xf32, #tpu.memory_space<vmem>>, vector<8x128xf32>
    %146 = arith.mulf %22, %141 : vector<8x128xf32>
    %147 = arith.addf %145, %146 : vector<8x128xf32>
    %c56_100 = arith.constant 56 : index
    %c0_101 = arith.constant 0 : index
    %148 = vector.load %arg4[%c56_100, %c0_101] : memref<120x128xf32, #tpu.memory_space<vmem>>, vector<8x128xf32>
    tpu.vector_store %arg4[%c56_100, %c0_101], %147 {strides = array<i32>} : memref<120x128xf32, #tpu.memory_space<vmem>>, vector<8x128xf32>,
    %c56_102 = arith.constant 56 : index
    %c0_103 = arith.constant 0 : index
    %149 = vector.load %arg5[%c56_102, %c0_103] : memref<120x128xf32, #tpu.memory_space<vmem>>, vector<8x128xf32>
    %150 = arith.mulf %29, %141 : vector<8x128xf32>
    %151 = arith.addf %149, %150 : vector<8x128xf32>
    %c56_104 = arith.constant 56 : index
    %c0_105 = arith.constant 0 : index
    %152 = vector.load %arg5[%c56_104, %c0_105] : memref<120x128xf32, #tpu.memory_space<vmem>>, vector<8x128xf32>
    tpu.vector_store %arg5[%c56_104, %c0_105], %151 {strides = array<i32>} : memref<120x128xf32, #tpu.memory_space<vmem>>, vector<8x128xf32>,
    %cst_106 = arith.constant 9.000000e+00 : f32
    %153 = vector.broadcast %cst_106 : f32 to vector<8x128xf32>
    %154 = arith.cmpf oeq, %32, %153 : vector<8x128xf32>
    %155 = arith.extui %154 : vector<8x128xi1> to vector<8x128xi32>
    %156 = arith.sitofp %155 : vector<8x128xi32> to vector<8x128xf32>
    %c64 = arith.constant 64 : index
    %c0_107 = arith.constant 0 : index
    %157 = vector.load %arg3[%c64, %c0_107] : memref<120x128xf32, #tpu.memory_space<vmem>>, vector<8x128xf32>
    %158 = arith.addf %157, %156 : vector<8x128xf32>
    %c64_108 = arith.constant 64 : index
    %c0_109 = arith.constant 0 : index
    %159 = vector.load %arg3[%c64_108, %c0_109] : memref<120x128xf32, #tpu.memory_space<vmem>>, vector<8x128xf32>
    tpu.vector_store %arg3[%c64_108, %c0_109], %158 {strides = array<i32>} : memref<120x128xf32, #tpu.memory_space<vmem>>, vector<8x128xf32>,
    %c64_110 = arith.constant 64 : index
    %c0_111 = arith.constant 0 : index
    %160 = vector.load %arg4[%c64_110, %c0_111] : memref<120x128xf32, #tpu.memory_space<vmem>>, vector<8x128xf32>
    %161 = arith.mulf %22, %156 : vector<8x128xf32>
    %162 = arith.addf %160, %161 : vector<8x128xf32>
    %c64_112 = arith.constant 64 : index
    %c0_113 = arith.constant 0 : index
    %163 = vector.load %arg4[%c64_112, %c0_113] : memref<120x128xf32, #tpu.memory_space<vmem>>, vector<8x128xf32>
    tpu.vector_store %arg4[%c64_112, %c0_113], %162 {strides = array<i32>} : memref<120x128xf32, #tpu.memory_space<vmem>>, vector<8x128xf32>,
    %c64_114 = arith.constant 64 : index
    %c0_115 = arith.constant 0 : index
    %164 = vector.load %arg5[%c64_114, %c0_115] : memref<120x128xf32, #tpu.memory_space<vmem>>, vector<8x128xf32>
    %165 = arith.mulf %29, %156 : vector<8x128xf32>
    %166 = arith.addf %164, %165 : vector<8x128xf32>
    %c64_116 = arith.constant 64 : index
    %c0_117 = arith.constant 0 : index
    %167 = vector.load %arg5[%c64_116, %c0_117] : memref<120x128xf32, #tpu.memory_space<vmem>>, vector<8x128xf32>
    tpu.vector_store %arg5[%c64_116, %c0_117], %166 {strides = array<i32>} : memref<120x128xf32, #tpu.memory_space<vmem>>, vector<8x128xf32>,
    %cst_118 = arith.constant 1.000000e+01 : f32
    %168 = vector.broadcast %cst_118 : f32 to vector<8x128xf32>
    %169 = arith.cmpf oeq, %32, %168 : vector<8x128xf32>
    %170 = arith.extui %169 : vector<8x128xi1> to vector<8x128xi32>
    %171 = arith.sitofp %170 : vector<8x128xi32> to vector<8x128xf32>
    %c72 = arith.constant 72 : index
    %c0_119 = arith.constant 0 : index
    %172 = vector.load %arg3[%c72, %c0_119] : memref<120x128xf32, #tpu.memory_space<vmem>>, vector<8x128xf32>
    %173 = arith.addf %172, %171 : vector<8x128xf32>
    %c72_120 = arith.constant 72 : index
    %c0_121 = arith.constant 0 : index
    %174 = vector.load %arg3[%c72_120, %c0_121] : memref<120x128xf32, #tpu.memory_space<vmem>>, vector<8x128xf32>
    tpu.vector_store %arg3[%c72_120, %c0_121], %173 {strides = array<i32>} : memref<120x128xf32, #tpu.memory_space<vmem>>, vector<8x128xf32>,
    %c72_122 = arith.constant 72 : index
    %c0_123 = arith.constant 0 : index
    %175 = vector.load %arg4[%c72_122, %c0_123] : memref<120x128xf32, #tpu.memory_space<vmem>>, vector<8x128xf32>
    %176 = arith.mulf %22, %171 : vector<8x128xf32>
    %177 = arith.addf %175, %176 : vector<8x128xf32>
    %c72_124 = arith.constant 72 : index
    %c0_125 = arith.constant 0 : index
    %178 = vector.load %arg4[%c72_124, %c0_125] : memref<120x128xf32, #tpu.memory_space<vmem>>, vector<8x128xf32>
    tpu.vector_store %arg4[%c72_124, %c0_125], %177 {strides = array<i32>} : memref<120x128xf32, #tpu.memory_space<vmem>>, vector<8x128xf32>,
    %c72_126 = arith.constant 72 : index
    %c0_127 = arith.constant 0 : index
    %179 = vector.load %arg5[%c72_126, %c0_127] : memref<120x128xf32, #tpu.memory_space<vmem>>, vector<8x128xf32>
    %180 = arith.mulf %29, %171 : vector<8x128xf32>
    %181 = arith.addf %179, %180 : vector<8x128xf32>
    %c72_128 = arith.constant 72 : index
    %c0_129 = arith.constant 0 : index
    %182 = vector.load %arg5[%c72_128, %c0_129] : memref<120x128xf32, #tpu.memory_space<vmem>>, vector<8x128xf32>
    tpu.vector_store %arg5[%c72_128, %c0_129], %181 {strides = array<i32>} : memref<120x128xf32, #tpu.memory_space<vmem>>, vector<8x128xf32>,
    %cst_130 = arith.constant 1.100000e+01 : f32
    %183 = vector.broadcast %cst_130 : f32 to vector<8x128xf32>
    %184 = arith.cmpf oeq, %32, %183 : vector<8x128xf32>
    %185 = arith.extui %184 : vector<8x128xi1> to vector<8x128xi32>
    %186 = arith.sitofp %185 : vector<8x128xi32> to vector<8x128xf32>
    %c80 = arith.constant 80 : index
    %c0_131 = arith.constant 0 : index
    %187 = vector.load %arg3[%c80, %c0_131] : memref<120x128xf32, #tpu.memory_space<vmem>>, vector<8x128xf32>
    %188 = arith.addf %187, %186 : vector<8x128xf32>
    %c80_132 = arith.constant 80 : index
    %c0_133 = arith.constant 0 : index
    %189 = vector.load %arg3[%c80_132, %c0_133] : memref<120x128xf32, #tpu.memory_space<vmem>>, vector<8x128xf32>
    tpu.vector_store %arg3[%c80_132, %c0_133], %188 {strides = array<i32>} : memref<120x128xf32, #tpu.memory_space<vmem>>, vector<8x128xf32>,
    %c80_134 = arith.constant 80 : index
    %c0_135 = arith.constant 0 : index
    %190 = vector.load %arg4[%c80_134, %c0_135] : memref<120x128xf32, #tpu.memory_space<vmem>>, vector<8x128xf32>
    %191 = arith.mulf %22, %186 : vector<8x128xf32>
    %192 = arith.addf %190, %191 : vector<8x128xf32>
    %c80_136 = arith.constant 80 : index
    %c0_137 = arith.constant 0 : index
    %193 = vector.load %arg4[%c80_136, %c0_137] : memref<120x128xf32, #tpu.memory_space<vmem>>, vector<8x128xf32>
    tpu.vector_store %arg4[%c80_136, %c0_137], %192 {strides = array<i32>} : memref<120x128xf32, #tpu.memory_space<vmem>>, vector<8x128xf32>,
    %c80_138 = arith.constant 80 : index
    %c0_139 = arith.constant 0 : index
    %194 = vector.load %arg5[%c80_138, %c0_139] : memref<120x128xf32, #tpu.memory_space<vmem>>, vector<8x128xf32>
    %195 = arith.mulf %29, %186 : vector<8x128xf32>
    %196 = arith.addf %194, %195 : vector<8x128xf32>
    %c80_140 = arith.constant 80 : index
    %c0_141 = arith.constant 0 : index
    %197 = vector.load %arg5[%c80_140, %c0_141] : memref<120x128xf32, #tpu.memory_space<vmem>>, vector<8x128xf32>
    tpu.vector_store %arg5[%c80_140, %c0_141], %196 {strides = array<i32>} : memref<120x128xf32, #tpu.memory_space<vmem>>, vector<8x128xf32>,
    %cst_142 = arith.constant 1.200000e+01 : f32
    %198 = vector.broadcast %cst_142 : f32 to vector<8x128xf32>
    %199 = arith.cmpf oeq, %32, %198 : vector<8x128xf32>
    %200 = arith.extui %199 : vector<8x128xi1> to vector<8x128xi32>
    %201 = arith.sitofp %200 : vector<8x128xi32> to vector<8x128xf32>
    %c88 = arith.constant 88 : index
    %c0_143 = arith.constant 0 : index
    %202 = vector.load %arg3[%c88, %c0_143] : memref<120x128xf32, #tpu.memory_space<vmem>>, vector<8x128xf32>
    %203 = arith.addf %202, %201 : vector<8x128xf32>
    %c88_144 = arith.constant 88 : index
    %c0_145 = arith.constant 0 : index
    %204 = vector.load %arg3[%c88_144, %c0_145] : memref<120x128xf32, #tpu.memory_space<vmem>>, vector<8x128xf32>
    tpu.vector_store %arg3[%c88_144, %c0_145], %203 {strides = array<i32>} : memref<120x128xf32, #tpu.memory_space<vmem>>, vector<8x128xf32>,
    %c88_146 = arith.constant 88 : index
    %c0_147 = arith.constant 0 : index
    %205 = vector.load %arg4[%c88_146, %c0_147] : memref<120x128xf32, #tpu.memory_space<vmem>>, vector<8x128xf32>
    %206 = arith.mulf %22, %201 : vector<8x128xf32>
    %207 = arith.addf %205, %206 : vector<8x128xf32>
    %c88_148 = arith.constant 88 : index
    %c0_149 = arith.constant 0 : index
    %208 = vector.load %arg4[%c88_148, %c0_149] : memref<120x128xf32, #tpu.memory_space<vmem>>, vector<8x128xf32>
    tpu.vector_store %arg4[%c88_148, %c0_149], %207 {strides = array<i32>} : memref<120x128xf32, #tpu.memory_space<vmem>>, vector<8x128xf32>,
    %c88_150 = arith.constant 88 : index
    %c0_151 = arith.constant 0 : index
    %209 = vector.load %arg5[%c88_150, %c0_151] : memref<120x128xf32, #tpu.memory_space<vmem>>, vector<8x128xf32>
    %210 = arith.mulf %29, %201 : vector<8x128xf32>
    %211 = arith.addf %209, %210 : vector<8x128xf32>
    %c88_152 = arith.constant 88 : index
    %c0_153 = arith.constant 0 : index
    %212 = vector.load %arg5[%c88_152, %c0_153] : memref<120x128xf32, #tpu.memory_space<vmem>>, vector<8x128xf32>
    tpu.vector_store %arg5[%c88_152, %c0_153], %211 {strides = array<i32>} : memref<120x128xf32, #tpu.memory_space<vmem>>, vector<8x128xf32>,
    %cst_154 = arith.constant 1.300000e+01 : f32
    %213 = vector.broadcast %cst_154 : f32 to vector<8x128xf32>
    %214 = arith.cmpf oeq, %32, %213 : vector<8x128xf32>
    %215 = arith.extui %214 : vector<8x128xi1> to vector<8x128xi32>
    %216 = arith.sitofp %215 : vector<8x128xi32> to vector<8x128xf32>
    %c96 = arith.constant 96 : index
    %c0_155 = arith.constant 0 : index
    %217 = vector.load %arg3[%c96, %c0_155] : memref<120x128xf32, #tpu.memory_space<vmem>>, vector<8x128xf32>
    %218 = arith.addf %217, %216 : vector<8x128xf32>
    %c96_156 = arith.constant 96 : index
    %c0_157 = arith.constant 0 : index
    %219 = vector.load %arg3[%c96_156, %c0_157] : memref<120x128xf32, #tpu.memory_space<vmem>>, vector<8x128xf32>
    tpu.vector_store %arg3[%c96_156, %c0_157], %218 {strides = array<i32>} : memref<120x128xf32, #tpu.memory_space<vmem>>, vector<8x128xf32>,
    %c96_158 = arith.constant 96 : index
    %c0_159 = arith.constant 0 : index
    %220 = vector.load %arg4[%c96_158, %c0_159] : memref<120x128xf32, #tpu.memory_space<vmem>>, vector<8x128xf32>
    %221 = arith.mulf %22, %216 : vector<8x128xf32>
    %222 = arith.addf %220, %221 : vector<8x128xf32>
    %c96_160 = arith.constant 96 : index
    %c0_161 = arith.constant 0 : index
    %223 = vector.load %arg4[%c96_160, %c0_161] : memref<120x128xf32, #tpu.memory_space<vmem>>, vector<8x128xf32>
    tpu.vector_store %arg4[%c96_160, %c0_161], %222 {strides = array<i32>} : memref<120x128xf32, #tpu.memory_space<vmem>>, vector<8x128xf32>,
    %c96_162 = arith.constant 96 : index
    %c0_163 = arith.constant 0 : index
    %224 = vector.load %arg5[%c96_162, %c0_163] : memref<120x128xf32, #tpu.memory_space<vmem>>, vector<8x128xf32>
    %225 = arith.mulf %29, %216 : vector<8x128xf32>
    %226 = arith.addf %224, %225 : vector<8x128xf32>
    %c96_164 = arith.constant 96 : index
    %c0_165 = arith.constant 0 : index
    %227 = vector.load %arg5[%c96_164, %c0_165] : memref<120x128xf32, #tpu.memory_space<vmem>>, vector<8x128xf32>
    tpu.vector_store %arg5[%c96_164, %c0_165], %226 {strides = array<i32>} : memref<120x128xf32, #tpu.memory_space<vmem>>, vector<8x128xf32>,
    %cst_166 = arith.constant 1.400000e+01 : f32
    %228 = vector.broadcast %cst_166 : f32 to vector<8x128xf32>
    %229 = arith.cmpf oeq, %32, %228 : vector<8x128xf32>
    %230 = arith.extui %229 : vector<8x128xi1> to vector<8x128xi32>
    %231 = arith.sitofp %230 : vector<8x128xi32> to vector<8x128xf32>
    %c104 = arith.constant 104 : index
    %c0_167 = arith.constant 0 : index
    %232 = vector.load %arg3[%c104, %c0_167] : memref<120x128xf32, #tpu.memory_space<vmem>>, vector<8x128xf32>
    %233 = arith.addf %232, %231 : vector<8x128xf32>
    %c104_168 = arith.constant 104 : index
    %c0_169 = arith.constant 0 : index
    %234 = vector.load %arg3[%c104_168, %c0_169] : memref<120x128xf32, #tpu.memory_space<vmem>>, vector<8x128xf32>
    tpu.vector_store %arg3[%c104_168, %c0_169], %233 {strides = array<i32>} : memref<120x128xf32, #tpu.memory_space<vmem>>, vector<8x128xf32>,
    %c104_170 = arith.constant 104 : index
    %c0_171 = arith.constant 0 : index
    %235 = vector.load %arg4[%c104_170, %c0_171] : memref<120x128xf32, #tpu.memory_space<vmem>>, vector<8x128xf32>
    %236 = arith.mulf %22, %231 : vector<8x128xf32>
    %237 = arith.addf %235, %236 : vector<8x128xf32>
    %c104_172 = arith.constant 104 : index
    %c0_173 = arith.constant 0 : index
    %238 = vector.load %arg4[%c104_172, %c0_173] : memref<120x128xf32, #tpu.memory_space<vmem>>, vector<8x128xf32>
    tpu.vector_store %arg4[%c104_172, %c0_173], %237 {strides = array<i32>} : memref<120x128xf32, #tpu.memory_space<vmem>>, vector<8x128xf32>,
    %c104_174 = arith.constant 104 : index
    %c0_175 = arith.constant 0 : index
    %239 = vector.load %arg5[%c104_174, %c0_175] : memref<120x128xf32, #tpu.memory_space<vmem>>, vector<8x128xf32>
    %240 = arith.mulf %29, %231 : vector<8x128xf32>
    %241 = arith.addf %239, %240 : vector<8x128xf32>
    %c104_176 = arith.constant 104 : index
    %c0_177 = arith.constant 0 : index
    %242 = vector.load %arg5[%c104_176, %c0_177] : memref<120x128xf32, #tpu.memory_space<vmem>>, vector<8x128xf32>
    tpu.vector_store %arg5[%c104_176, %c0_177], %241 {strides = array<i32>} : memref<120x128xf32, #tpu.memory_space<vmem>>, vector<8x128xf32>,
    %cst_178 = arith.constant 1.500000e+01 : f32
    %243 = vector.broadcast %cst_178 : f32 to vector<8x128xf32>
    %244 = arith.cmpf oeq, %32, %243 : vector<8x128xf32>
    %245 = arith.extui %244 : vector<8x128xi1> to vector<8x128xi32>
    %246 = arith.sitofp %245 : vector<8x128xi32> to vector<8x128xf32>
    %c112 = arith.constant 112 : index
    %c0_179 = arith.constant 0 : index
    %247 = vector.load %arg3[%c112, %c0_179] : memref<120x128xf32, #tpu.memory_space<vmem>>, vector<8x128xf32>
    %248 = arith.addf %247, %246 : vector<8x128xf32>
    %c112_180 = arith.constant 112 : index
    %c0_181 = arith.constant 0 : index
    %249 = vector.load %arg3[%c112_180, %c0_181] : memref<120x128xf32, #tpu.memory_space<vmem>>, vector<8x128xf32>
    tpu.vector_store %arg3[%c112_180, %c0_181], %248 {strides = array<i32>} : memref<120x128xf32, #tpu.memory_space<vmem>>, vector<8x128xf32>,
    %c112_182 = arith.constant 112 : index
    %c0_183 = arith.constant 0 : index
    %250 = vector.load %arg4[%c112_182, %c0_183] : memref<120x128xf32, #tpu.memory_space<vmem>>, vector<8x128xf32>
    %251 = arith.mulf %22, %246 : vector<8x128xf32>
    %252 = arith.addf %250, %251 : vector<8x128xf32>
    %c112_184 = arith.constant 112 : index
    %c0_185 = arith.constant 0 : index
    %253 = vector.load %arg4[%c112_184, %c0_185] : memref<120x128xf32, #tpu.memory_space<vmem>>, vector<8x128xf32>
    tpu.vector_store %arg4[%c112_184, %c0_185], %252 {strides = array<i32>} : memref<120x128xf32, #tpu.memory_space<vmem>>, vector<8x128xf32>,
    %c112_186 = arith.constant 112 : index
    %c0_187 = arith.constant 0 : index
    %254 = vector.load %arg5[%c112_186, %c0_187] : memref<120x128xf32, #tpu.memory_space<vmem>>, vector<8x128xf32>
    %255 = arith.mulf %29, %246 : vector<8x128xf32>
    %256 = arith.addf %254, %255 : vector<8x128xf32>
    %c112_188 = arith.constant 112 : index
    %c0_189 = arith.constant 0 : index
    %257 = vector.load %arg5[%c112_188, %c0_189] : memref<120x128xf32, #tpu.memory_space<vmem>>, vector<8x128xf32>
    tpu.vector_store %arg5[%c112_188, %c0_189], %256 {strides = array<i32>} : memref<120x128xf32, #tpu.memory_space<vmem>>, vector<8x128xf32>,
    return
  }
  func.func @transform_0(%arg0: i32) -> (i32, i32) {
    %c0_i32 = arith.constant 0 : i32
    %c0_i32_0 = arith.constant 0 : i32
    return %arg0, %c0_i32 : i32, i32
  }
  func.func @transform_1(%arg0: i32) -> (i32, i32) {
    %c0_i32 = arith.constant 0 : i32
    %c0_i32_0 = arith.constant 0 : i32
    return %arg0, %c0_i32 : i32, i32
  }
  func.func @transform_2(%arg0: i32) -> (i32, i32) {
    %c0_i32 = arith.constant 0 : i32
    %c0_i32_0 = arith.constant 0 : i32
    %c0_i32_1 = arith.constant 0 : i32
    return %c0_i32, %c0_i32_0 : i32, i32
  }
  func.func @transform_3(%arg0: i32) -> (i32, i32) {
    %c0_i32 = arith.constant 0 : i32
    %c0_i32_0 = arith.constant 0 : i32
    %c0_i32_1 = arith.constant 0 : i32
    return %c0_i32, %c0_i32_0 : i32, i32
  }
  func.func @transform_4(%arg0: i32) -> (i32, i32) {
    %c0_i32 = arith.constant 0 : i32
    %c0_i32_0 = arith.constant 0 : i32
    %c0_i32_1 = arith.constant 0 : i32
    return %c0_i32, %c0_i32_0 : i32, i32
  }
}

</mosaic_0001>

<bundles_post_ra>
// kernel: tpu_custom_call.1
= control target key start
LH: loop header
LB: loop body
LE: loop exit
PB: predicated region body
PF: predicated region fallthrough
CT: control target
= control target key end

     0   :  { %10 = vsyncpa [#allocation3], 0  ;;  %s666_s0 = inlined_call_operand.hbm [shape: f32[8,128], index: 0, kind: input, shape index: {}]   ;;  %s667_s1 = inlined_call_operand.hbm [shape: f32[8,128], index: 1, kind: input, shape index: {}]   ;;  %s668_s2 = inlined_call_operand.hbm [shape: f32[120,128], index: 2, kind: output, shape index: {0}]   ;;  %s669_s3 = inlined_call_operand.hbm [shape: f32[120,128], index: 3, kind: output, shape index: {1}]   ;;  %s670_s4 = inlined_call_operand.hbm [shape: f32[120,128], index: 4, kind: output, shape index: {2}]  }
   0x1   :  { %11 = vsyncpa [#allocation6], 0 }
   0x2   :  { %12 = vsyncpa [#allocation4], 0 }
   0x3   :  { %13 = vsyncpa [#allocation9], 0  ;;  %s19_s17 = sshll.u32 %s666_s0, 4  ;;  %s538_s18 = smov [#allocation2]   ;;  %s20_s17 = int_to_ptr.hbm [resolvable:$true] %s19_s17 }
   0x4   :  { %s21_s19 = sshll.u32 %s538_s18, 4  ;;  %s30_s22 = sshll.u32 %s667_s1, 4  ;;  %s22_s19 = int_to_ptr.vmem [resolvable:$true] %s21_s19  ;;  %s31_s22 = int_to_ptr.hbm [resolvable:$true] %s30_s22 }
   0x5   :  { %24 = dma.hbm_to_vmem [thread:$0]  %s20_s17, 128, %s22_s19, [#allocation3]  }
   0x6   :  { %s539_s23 = smov [#allocation5]  }
   0x7   :  { %s32_s24 = sshll.u32 %s539_s23, 4  ;;  %s33_s24 = int_to_ptr.vmem [resolvable:$true] %s32_s24 }
   0x8   :  { %35 = dma.hbm_to_vmem [thread:$0]  %s31_s22, 128, %s33_s24, [#allocation6]  }
   0x9   :  { %530 = dma.done.wait [#allocation3], 128  }
   0xa   :  { %531 = vsyncadd [#allocation3], 4294967168 }
   0xb   :  { %532 = dma.done.wait [#allocation6], 128  }
   0xc   :  { %533 = vsyncadd [#allocation6], 4294967168  ;;  %v99_v0 = vlaneseq  ;;  %v93_v2 = vld [vmem:[#allocation2] sm:$0xff]  ;;  %v94_v12 = vld [vmem:[#allocation5] sm:$0xff]  ;;  %v540_v13 = vmov 0.0   ;;  %s541_s0 = smov [#allocation8]  }
   0xd   :  { %v95_v3 = vmul.f32 0.5, %v93_v2  ;;  %s345_s1 = sshll.u32 %s541_s0, 4  ;;  %s347_s27 = sshll.u32 %s669_s3, 4  ;;  %s346_s1 = int_to_ptr.vmem [resolvable:$true] %s345_s1  ;;  %s348_s27 = int_to_ptr.hbm [resolvable:$true] %s347_s27 }
   0xe   :  { %v100_v1 = vshrl.u32 %v99_v0, 7  ;;  %v102_v4 = vand.u32 127, %v99_v0  ;;  %s542_s28 = smov 128   ;;  %s543_s29 = smov 8  }
   0xf   :  { %408 = vtanh.f32 %v95_v3  ;;  %s544_s3 = smov [#allocation7]   ;;  %s334_s7 = sshll.u32 %s668_s2, 4  ;;  %s335_s7 = int_to_ptr.hbm [resolvable:$true] %s334_s7 }
  0x10   :  { %v105_v5 = vmul.u32 128, %v100_v1  ;;  %s332_s30 = sshll.u32 %s544_s3, 4  ;;  %s545_s8 = smov [#allocation10]   ;;  %s333_s30 = int_to_ptr.vmem [resolvable:$true] %s332_s30 }
  0x11   :  { %s358_s9 = sshll.u32 %s545_s8, 4  ;;  %s360_s12 = sshll.u32 %s670_s4, 4  ;;  %s359_s9 = int_to_ptr.vmem [resolvable:$true] %s358_s9  ;;  %s361_s12 = int_to_ptr.hbm [resolvable:$true] %s360_s12 }
  0x12   :  { %v106_v6 = vadd.s32 %v105_v5, %v102_v4 }
  0x14   :  { %vm108_vm0 = vcmp.lt.s32.totalorder %v106_v6, 512 }
  0x15   :  { %v409_v7 = vpop.eup %408 }
  0x16   :  { %v97_v8 = vmul.f32 0.5, %v409_v7 }
  0x18   :  { %v98_v9 = vadd.f32 0.5, %v97_v8 }
  0x1a   :  { %v109_v10 = vsel %vm108_vm0, %v98_v9, 0.0 }
  0x1b   :  { %v116_v11 = vmul.f32 15.0, %v109_v10  ;;  %vm110_vm1 = vcmp.gt.f32.partialorder %v109_v10, 0.5 }
  0x1c   :  { %v383_v14 = vsel %vm110_vm1, 1.0, %v540_v13 }
  0x1d   :  { %v117_v15 = vceil.f32 %v116_v11  ;;  %vm113_vm6 = vcmp.eq.f32.partialorder %v383_v14, %v94_v12 }
  0x1e   :  { %v384_v40 = vsel %vm113_vm6, 1.0, %v540_v13 }
  0x1f   :  { %vm118_vm2 = vcmp.eq.f32.partialorder %v117_v15, 1.0  ;;  %vm132_vm3 = vcmp.eq.f32.partialorder %v117_v15, 2.0  ;;  %vm146_vm4 = vcmp.eq.f32.partialorder %v117_v15, 3.0  ;;  %vm160_vm5 = vcmp.eq.f32.partialorder %v117_v15, 4.0 }
  0x20   :  { %v577_v16 = vsel %vm118_vm2, 1.0, %v540_v13  ;;  %v579_v17 = vsel %vm132_vm3, 1.0, %v540_v13  ;;  %v581_v18 = vsel %vm146_vm4, 1.0, %v540_v13  ;;  %v583_v19 = vsel %vm160_vm5, 1.0, %v540_v13 }
  0x21   :  { %v125_v20 = vmul.f32 %v577_v16, %v109_v10  ;;  %v139_v21 = vmul.f32 %v579_v17, %v109_v10  ;;  %v153_v22 = vmul.f32 %v581_v18, %v109_v10  ;;  %v167_v23 = vmul.f32 %v583_v19, %v109_v10  ;;  %123 = vst [vmem:[#allocation7] sm:$0xff] %v577_v16 }
  0x22   :  { %vm174_vm7 = vcmp.eq.f32.partialorder %v117_v15, 5.0  ;;  %vm188_vm8 = vcmp.eq.f32.partialorder %v117_v15, 6.0  ;;  %vm202_vm9 = vcmp.eq.f32.partialorder %v117_v15, 7.0  ;;  %vm216_vm10 = vcmp.eq.f32.partialorder %v117_v15, 8.0  ;;  %137 = vst [vmem:[#allocation7 + $0x8] sm:$0xff] %v579_v17 }
  0x23   :  { %v589_v24 = vsel %vm174_vm7, 1.0, %v540_v13  ;;  %v591_v25 = vsel %vm188_vm8, 1.0, %v540_v13  ;;  %v593_v26 = vsel %vm202_vm9, 1.0, %v540_v13  ;;  %v595_v27 = vsel %vm216_vm10, 1.0, %v540_v13  ;;  %127 = vst [vmem:[#allocation8] sm:$0xff] %v125_v20 }
  0x24   :  { %v181_v28 = vmul.f32 %v589_v24, %v109_v10  ;;  %v195_v29 = vmul.f32 %v591_v25, %v109_v10  ;;  %v209_v30 = vmul.f32 %v593_v26, %v109_v10  ;;  %v223_v31 = vmul.f32 %v595_v27, %v109_v10  ;;  %141 = vst [vmem:[#allocation8 + $0x8] sm:$0xff] %v139_v21 }
  0x25   :  { %vm230_vm11 = vcmp.eq.f32.partialorder %v117_v15, 9.0  ;;  %vm244_vm12 = vcmp.eq.f32.partialorder %v117_v15, 10.0  ;;  %vm258_vm13 = vcmp.eq.f32.partialorder %v117_v15, 11.0  ;;  %vm272_vm14 = vcmp.eq.f32.partialorder %v117_v15, 12.0  ;;  %155 = vst [vmem:[#allocation8 + $0x10] sm:$0xff] %v153_v22 }
  0x26   :  { %169 = vst [vmem:[#allocation8 + $0x18] sm:$0xff] %v167_v23  ;;  %v601_v32 = vsel %vm230_vm11, 1.0, %v540_v13  ;;  %v603_v33 = vsel %vm244_vm12, 1.0, %v540_v13  ;;  %v605_v34 = vsel %vm258_vm13, 1.0, %v540_v13  ;;  %v607_v35 = vsel %vm272_vm14, 1.0, %v540_v13 }
  0x27   :  { %183 = vst [vmem:[#allocation8 + $0x20] sm:$0xff] %v181_v28  ;;  %v237_v36 = vmul.f32 %v601_v32, %v109_v10  ;;  %v251_v37 = vmul.f32 %v603_v33, %v109_v10  ;;  %v265_v38 = vmul.f32 %v605_v34, %v109_v10  ;;  %v279_v39 = vmul.f32 %v607_v35, %v109_v10 }
  0x28   :  { %197 = vst [vmem:[#allocation8 + $0x28] sm:$0xff] %v195_v29  ;;  %vm286_vm15 = vcmp.eq.f32.partialorder %v117_v15, 13.0  ;;  %vm300_vm0 = vcmp.eq.f32.partialorder %v117_v15, 14.0  ;;  %vm314_vm1 = vcmp.eq.f32.partialorder %v117_v15, 15.0  ;;  %v129_v47 = vmul.f32 %v577_v16, %v384_v40 }
  0x29   :  { %211 = vst [vmem:[#allocation8 + $0x30] sm:$0xff] %v209_v30  ;;  %v397_v41 = vsel %vm286_vm15, 1.0, %v540_v13  ;;  %v614_v42 = vsel %vm300_vm0, 1.0, %v540_v13  ;;  %v616_v43 = vsel %vm314_vm1, 1.0, %v540_v13  ;;  %v143_v48 = vmul.f32 %v579_v17, %v384_v40 }
  0x2a   :  { %225 = vst [vmem:[#allocation8 + $0x38] sm:$0xff] %v223_v31  ;;  %v293_v44 = vmul.f32 %v397_v41, %v109_v10  ;;  %v307_v45 = vmul.f32 %v614_v42, %v109_v10  ;;  %v321_v46 = vmul.f32 %v616_v43, %v109_v10  ;;  %v157_v49 = vmul.f32 %v581_v18, %v384_v40 }
  0x2b   :  { %239 = vst [vmem:[#allocation8 + $0x40] sm:$0xff] %v237_v36  ;;  %v171_v50 = vmul.f32 %v583_v19, %v384_v40  ;;  %v185_v51 = vmul.f32 %v589_v24, %v384_v40  ;;  %v199_v52 = vmul.f32 %v591_v25, %v384_v40  ;;  %v213_v53 = vmul.f32 %v593_v26, %v384_v40 }
  0x2c   :  { %253 = vst [vmem:[#allocation8 + $0x48] sm:$0xff] %v251_v37  ;;  %v227_v54 = vmul.f32 %v595_v27, %v384_v40  ;;  %v241_v55 = vmul.f32 %v601_v32, %v384_v40  ;;  %v255_v56 = vmul.f32 %v603_v33, %v384_v40  ;;  %v269_v57 = vmul.f32 %v605_v34, %v384_v40 }
  0x2d   :  { %267 = vst [vmem:[#allocation8 + $0x50] sm:$0xff] %v265_v38  ;;  %v283_v58 = vmul.f32 %v607_v35, %v384_v40  ;;  %v297_v59 = vmul.f32 %v397_v41, %v384_v40  ;;  %v311_v60 = vmul.f32 %v614_v42, %v384_v40  ;;  %v325_v61 = vmul.f32 %v616_v43, %v384_v40 }
  0x2e   :  { %281 = vst [vmem:[#allocation8 + $0x58] sm:$0xff] %v279_v39 }
  0x2f   :  { %295 = vst [vmem:[#allocation8 + $0x60] sm:$0xff] %v293_v44 }
  0x30   :  { %309 = vst [vmem:[#allocation8 + $0x68] sm:$0xff] %v307_v45 }
  0x31   :  { %323 = vst [vmem:[#allocation8 + $0x70] sm:$0xff] %v321_v46 }
  0x32   :  { %353 = dma.vmem_to_hbm [thread:$0]  %s346_s1, 1920, %s348_s27, [#allocation9], %s542_s28, %s542_s28, %s543_s29   ;;  %131 = vst [vmem:[#allocation10] sm:$0xff] %v129_v47 }
  0x33   :  { %145 = vst [vmem:[#allocation10 + $0x8] sm:$0xff] %v143_v48 }
  0x34   :  { %151 = vst [vmem:[#allocation7 + $0x10] sm:$0xff] %v581_v18 }
  0x35   :  { %159 = vst [vmem:[#allocation10 + $0x10] sm:$0xff] %v157_v49 }
  0x36   :  { %165 = vst [vmem:[#allocation7 + $0x18] sm:$0xff] %v583_v19 }
  0x37   :  { %173 = vst [vmem:[#allocation10 + $0x18] sm:$0xff] %v171_v50 }
  0x38   :  { %179 = vst [vmem:[#allocation7 + $0x20] sm:$0xff] %v589_v24 }
  0x39   :  { %187 = vst [vmem:[#allocation10 + $0x20] sm:$0xff] %v185_v51 }
  0x3a   :  { %193 = vst [vmem:[#allocation7 + $0x28] sm:$0xff] %v591_v25 }
  0x3b   :  { %201 = vst [vmem:[#allocation10 + $0x28] sm:$0xff] %v199_v52 }
  0x3c   :  { %207 = vst [vmem:[#allocation7 + $0x30] sm:$0xff] %v593_v26 }
  0x3d   :  { %215 = vst [vmem:[#allocation10 + $0x30] sm:$0xff] %v213_v53 }
  0x3e   :  { %221 = vst [vmem:[#allocation7 + $0x38] sm:$0xff] %v595_v27 }
  0x3f   :  { %229 = vst [vmem:[#allocation10 + $0x38] sm:$0xff] %v227_v54 }
  0x40   :  { %235 = vst [vmem:[#allocation7 + $0x40] sm:$0xff] %v601_v32 }
  0x41   :  { %243 = vst [vmem:[#allocation10 + $0x40] sm:$0xff] %v241_v55 }
  0x42   :  { %249 = vst [vmem:[#allocation7 + $0x48] sm:$0xff] %v603_v33 }
  0x43   :  { %257 = vst [vmem:[#allocation10 + $0x48] sm:$0xff] %v255_v56 }
  0x44   :  { %263 = vst [vmem:[#allocation7 + $0x50] sm:$0xff] %v605_v34 }
  0x45   :  { %271 = vst [vmem:[#allocation10 + $0x50] sm:$0xff] %v269_v57 }
  0x46   :  { %277 = vst [vmem:[#allocation7 + $0x58] sm:$0xff] %v607_v35 }
  0x47   :  { %285 = vst [vmem:[#allocation10 + $0x58] sm:$0xff] %v283_v58 }
  0x48   :  { %291 = vst [vmem:[#allocation7 + $0x60] sm:$0xff] %v397_v41 }
  0x49   :  { %299 = vst [vmem:[#allocation10 + $0x60] sm:$0xff] %v297_v59 }
  0x4a   :  { %305 = vst [vmem:[#allocation7 + $0x68] sm:$0xff] %v614_v42 }
  0x4b   :  { %313 = vst [vmem:[#allocation10 + $0x68] sm:$0xff] %v311_v60 }
  0x4c   :  { %319 = vst [vmem:[#allocation7 + $0x70] sm:$0xff] %v616_v43 }
  0x4d   :  { %327 = vst [vmem:[#allocation10 + $0x70] sm:$0xff] %v325_v61  ;;  %340 = dma.vmem_to_hbm [thread:$0]  %s333_s30, 1920, %s335_s7, [#allocation4], %s542_s28, %s542_s28, %s543_s29  }
  0x4e   :  { %366 = dma.vmem_to_hbm [thread:$0]  %s359_s9, 1920, %s361_s12, [#allocation9], %s542_s28, %s542_s28, %s543_s29  }
  0x4f   :  { %534 = dma.done.wait [#allocation4], 1920  }
  0x50   :  { %535 = vsyncadd [#allocation4], 4294965376 }
  0x51   :  { %536 = dma.done.wait [#allocation9], 3840  }
  0x52   :  { %537 = vsyncadd [#allocation9], 4294963456 }
  0x53   :  { %379 = vsyncpa [#allocation3], 1 }
  0x54   :  { %380 = vsyncpa [#allocation6], 1 }
  0x55   :  { %381 = vsyncpa [#allocation4], 1 }
  0x56   :  { %382 = vsyncpa [#allocation9], 1 }

</bundles_post_ra>
